<compile_context>
chip_gen: v5e
topology: v5e:2x2
jax: 0.10.0
libtpu: 0.0.40
codegen_flags: <defaults>
</compile_context>

<pallas_src>
import functools

import jax
import jax.numpy as jnp
from jax.experimental import pallas as pl
from jax.experimental.pallas import tpu as pltpu

# ---- model dims (match forward semantics: 3-ch images, 18-ch pose maps, 8-ch parsing) ----
C_IMG = 3      # P1 / P2 channels
C_POSE = 18    # BP1 / BP2 channels
C_PARS = 8     # SPL1 / SPL2 channels
HID = 32


def _generator_kernel(p1_ref, p2_ref, bp1_ref, bp2_ref, spl1_ref, spl2_ref,
                      w_p1_ref, w_p2_ref, w_bp1_ref, w_bp2_ref, w_spl1_ref, w_spl2_ref,
                      b1_ref, w2_ref, b2_ref,
                      wim_ref, bim_ref, wpr_ref, bpr_ref,
                      img_ref, pars_ref, reg_ref,
                      *, tm, hw_valid, hw_padded):
    j = pl.program_id(1)

    def fused(w_ref, x_ref):
        # (HID, C) @ (C, TM) -> (HID, TM): pixels stay on the lane axis, f32 MXU accumulate
        return jnp.dot(w_ref[...], x_ref[0].astype(jnp.float32),
                       preferred_element_type=jnp.float32)

    # fuse all six conditioning inputs: 1x1 conv (58 -> HID) as six partial matmuls + ReLU
    h1 = (fused(w_p1_ref, p1_ref) + fused(w_p2_ref, p2_ref)
          + fused(w_bp1_ref, bp1_ref) + fused(w_bp2_ref, bp2_ref)
          + fused(w_spl1_ref, spl1_ref) + fused(w_spl2_ref, spl2_ref)
          + b1_ref[...])
    h1 = jnp.maximum(h1, 0.0)

    # hidden 1x1 conv (HID -> HID) + ReLU
    h2 = jnp.dot(w2_ref[...], h1, preferred_element_type=jnp.float32) + b2_ref[...]
    h2 = jnp.maximum(h2, 0.0)

    # image head (HID -> 3), tanh (EUP)
    img = jnp.tanh(jnp.dot(wim_ref[...], h2, preferred_element_type=jnp.float32)
                   + bim_ref[...])
    img_ref[0] = img.astype(img_ref.dtype)

    # parsing head (HID -> 8), softmax over channel (sublane) axis
    logits = jnp.dot(wpr_ref[...], h2, preferred_element_type=jnp.float32) + bpr_ref[...]
    m = jnp.max(logits, axis=0, keepdims=True)
    e = jnp.exp(logits - m)
    pars = e * pl.reciprocal(jnp.sum(e, axis=0, keepdims=True), approx=True)
    pars_ref[0] = pars.astype(pars_ref.dtype)

    # regularization: per-tile partial sum of squared hidden features (parallel-safe)
    h2sq = h2 * h2
    if hw_padded != hw_valid:  # static branch: only compiled when the pixel axis was padded
        lane = jax.lax.broadcasted_iota(jnp.int32, (HID, tm), 1)
        gidx = j * tm + lane
        h2sq = jnp.where(gidx < hw_valid, h2sq, 0.0)
    reg_ref[...] = jnp.full(reg_ref.shape, jnp.sum(h2sq), dtype=reg_ref.dtype)


def _pick_tile(hw):
    for cand in (8192, 4096, 2048, 1024, 512, 256, 128):
        if hw % cand == 0:
            return cand, hw
    tm = 512
    return tm, pl.cdiv(hw, tm) * tm   # pad pixels up; kernel masks the loss contribution


def generator_forward(P1, P2, BP1, BP2, SPL1, SPL2, params):
    """All inputs NCHW float32. Returns (generated_img NCHW, loss_reg scalar, parsav NCHW)."""
    B, _, H, W = P1.shape
    hw = H * W
    tm, hw_pad = _pick_tile(hw)
    n_j = hw_pad // tm

    def prep(x):  # NCHW -> (B, C, H*W)  (contiguous reshape: no data movement)
        c = x.shape[1]
        x = x.astype(jnp.float32).reshape(B, c, hw)
        if hw_pad != hw:
            x = jnp.pad(x, ((0, 0), (0, 0), (0, hw_pad - hw)))
        return x

    p1, p2 = prep(P1), prep(P2)
    bp1, bp2 = prep(BP1), prep(BP2)
    spl1, spl2 = prep(SPL1), prep(SPL2)

    def x_spec(c):
        return pl.BlockSpec((1, c, tm), lambda b, j: (b, 0, j))

    def w_spec(shape):
        # constant block index -> Pallas keeps the block resident (no re-DMA per step)
        return pl.BlockSpec(shape, lambda b, j: tuple(0 for _ in shape))

    kernel = functools.partial(_generator_kernel, tm=tm, hw_valid=hw, hw_padded=hw_pad)

    img, pars, reg_part = pl.pallas_call(
        kernel,
        out_shape=(
            jax.ShapeDtypeStruct((B, C_IMG, hw_pad), jnp.float32),
            jax.ShapeDtypeStruct((B, C_PARS, hw_pad), jnp.float32),
            jax.ShapeDtypeStruct((B, n_j, 8, 128), jnp.float32),   # per-tile loss partials
        ),
        grid_spec=pltpu.PrefetchScalarGridSpec(
            num_scalar_prefetch=0,
            grid=(B, n_j),
            in_specs=[
                x_spec(C_IMG), x_spec(C_IMG),
                x_spec(C_POSE), x_spec(C_POSE),
                x_spec(C_PARS), x_spec(C_PARS),
                w_spec((HID, C_IMG)), w_spec((HID, C_IMG)),
                w_spec((HID, C_POSE)), w_spec((HID, C_POSE)),
                w_spec((HID, C_PARS)), w_spec((HID, C_PARS)),
                w_spec((HID, 1)),
                w_spec((HID, HID)), w_spec((HID, 1)),
                w_spec((C_IMG, HID)), w_spec((C_IMG, 1)),
                w_spec((C_PARS, HID)), w_spec((C_PARS, 1)),
            ],
            out_specs=[
                pl.BlockSpec((1, C_IMG, tm), lambda b, j: (b, 0, j)),
                pl.BlockSpec((1, C_PARS, tm), lambda b, j: (b, 0, j)),
                pl.BlockSpec((1, 1, 8, 128), lambda b, j: (b, j, 0, 0)),
            ],
        ),
        compiler_params=pltpu.CompilerParams(
            dimension_semantics=("parallel", "parallel"),
            vmem_limit_bytes=32 * 1024 * 1024),
    )(p1, p2, bp1, bp2, spl1, spl2,
      params["w_p1"], params["w_p2"], params["w_bp1"], params["w_bp2"],
      params["w_spl1"], params["w_spl2"],
      params["b1"], params["w2"], params["b2"],
      params["wim"], params["bim"], params["wpr"], params["bpr"])

    generated_img = img[:, :, :hw].reshape(B, C_IMG, H, W)
    parsav = pars[:, :, :hw].reshape(B, C_PARS, H, W)
    loss_reg = reg_part[:, :, 0, 0].sum() / jnp.float32(B * hw * HID)
    return generated_img, loss_reg, parsav


def _reference_forward(P1, P2, BP1, BP2, SPL1, SPL2, params):
    """Pure-JAX reference for correctness checking."""
    B, _, H, W = P1.shape
    hw = H * W

    def flat(x):
        return x.astype(jnp.float32).reshape(B, x.shape[1], hw)

    p1, p2, bp1, bp2, spl1, spl2 = map(flat, (P1, P2, BP1, BP2, SPL1, SPL2))
    h1 = (jnp.einsum("hc,bcm->bhm", params["w_p1"], p1)
          + jnp.einsum("hc,bcm->bhm", params["w_p2"], p2)
          + jnp.einsum("hc,bcm->bhm", params["w_bp1"], bp1)
          + jnp.einsum("hc,bcm->bhm", params["w_bp2"], bp2)
          + jnp.einsum("hc,bcm->bhm", params["w_spl1"], spl1)
          + jnp.einsum("hc,bcm->bhm", params["w_spl2"], spl2)
          + params["b1"][None])
    h1 = jnp.maximum(h1, 0.0)
    h2 = jnp.maximum(jnp.einsum("hk,bkm->bhm", params["w2"], h1) + params["b2"][None], 0.0)
    img = jnp.tanh(jnp.einsum("ch,bhm->bcm", params["wim"], h2) + params["bim"][None])
    logits = jnp.einsum("ch,bhm->bcm", params["wpr"], h2) + params["bpr"][None]
    pars = jax.nn.softmax(logits, axis=1)
    loss = jnp.mean(h2 * h2)
    return img.reshape(B, C_IMG, H, W), loss, pars.reshape(B, C_PARS, H, W)


def init_params(key):
    ks = jax.random.split(key, 8)
    gain = 0.02
    return {
        # first layer, split per input (channels-first orientation: (HID, C_in))
        "w_p1":   gain * jax.random.normal(ks[0], (HID, C_IMG), jnp.float32),
        "w_p2":   gain * jax.random.normal(ks[1], (HID, C_IMG), jnp.float32),
        "w_bp1":  gain * jax.random.normal(ks[2], (HID, C_POSE), jnp.float32),
        "w_bp2":  gain * jax.random.normal(ks[3], (HID, C_POSE), jnp.float32),
        "w_spl1": gain * jax.random.normal(ks[4], (HID, C_PARS), jnp.float32),
        "w_spl2": gain * jax.random.normal(ks[5], (HID, C_PARS), jnp.float32),
        "b1": jnp.zeros((HID, 1), jnp.float32),
        "w2": gain * jax.random.normal(ks[6], (HID, HID), jnp.float32),
        "b2": jnp.zeros((HID, 1), jnp.float32),
        "wim": gain * jax.random.normal(ks[7], (C_IMG, HID), jnp.float32),
        "bim": jnp.zeros((C_IMG, 1), jnp.float32),
        "wpr": gain * jax.random.normal(jax.random.fold_in(key, 99), (C_PARS, HID), jnp.float32),
        "bpr": jnp.zeros((C_PARS, 1), jnp.float32),
    }


if __name__ == "__main__":
    import numpy as np

    key = jax.random.PRNGKey(0)
    kp, k1, k2, k3, k4, k5, k6 = jax.random.split(key, 7)

    B, H, W = 2, 16, 16
    P1 = jax.random.normal(k1, (B, C_IMG, H, W), jnp.float32)
    P2 = jax.random.normal(k2, (B, C_IMG, H, W), jnp.float32)
    BP1 = jax.random.normal(k3, (B, C_POSE, H, W), jnp.float32)
    BP2 = jax.random.normal(k4, (B, C_POSE, H, W), jnp.float32)
    SPL1 = jax.random.normal(k5, (B, C_PARS, H, W), jnp.float32)
    SPL2 = jax.random.normal(k6, (B, C_PARS, H, W), jnp.float32)

    params = init_params(kp)

    generated_img, loss_reg, parsav = generator_forward(P1, P2, BP1, BP2, SPL1, SPL2, params)
    jax.block_until_ready((generated_img, loss_reg, parsav))

    assert generated_img.shape == (B, C_IMG, H, W)
    assert parsav.shape == (B, C_PARS, H, W)
    assert loss_reg.shape == ()

    # pure-JAX reference check (loose tolerance: pl.reciprocal(approx=True) in softmax)
    ref_img, ref_loss, ref_pars = _reference_forward(P1, P2, BP1, BP2, SPL1, SPL2, params)
    np.testing.assert_allclose(np.asarray(generated_img), np.asarray(ref_img),
                               rtol=1e-2, atol=1e-2)
    np.testing.assert_allclose(np.asarray(parsav), np.asarray(ref_pars),
                               rtol=1e-2, atol=1e-2)
    np.testing.assert_allclose(np.asarray(loss_reg), np.asarray(ref_loss),
                               rtol=1e-2, atol=1e-4)

    print("KERNEL_OK")
</pallas_src>

<mosaic_0001>
module attributes {stable_mosaic.version = 11 : i64} {
  func.func @_generator_kernel(%arg0: i32, %arg1: i32, %arg2: memref<1x3x256xf32, #tpu.memory_space<vmem>>, %arg3: memref<1x3x256xf32, #tpu.memory_space<vmem>>, %arg4: memref<1x18x256xf32, #tpu.memory_space<vmem>>, %arg5: memref<1x18x256xf32, #tpu.memory_space<vmem>>, %arg6: memref<1x8x256xf32, #tpu.memory_space<vmem>>, %arg7: memref<1x8x256xf32, #tpu.memory_space<vmem>>, %arg8: memref<32x3xf32, #tpu.memory_space<vmem>>, %arg9: memref<32x3xf32, #tpu.memory_space<vmem>>, %arg10: memref<32x18xf32, #tpu.memory_space<vmem>>, %arg11: memref<32x18xf32, #tpu.memory_space<vmem>>, %arg12: memref<32x8xf32, #tpu.memory_space<vmem>>, %arg13: memref<32x8xf32, #tpu.memory_space<vmem>>, %arg14: memref<32x1xf32, #tpu.memory_space<vmem>>, %arg15: memref<32x32xf32, #tpu.memory_space<vmem>>, %arg16: memref<32x1xf32, #tpu.memory_space<vmem>>, %arg17: memref<3x32xf32, #tpu.memory_space<vmem>>, %arg18: memref<3x1xf32, #tpu.memory_space<vmem>>, %arg19: memref<8x32xf32, #tpu.memory_space<vmem>>, %arg20: memref<8x1xf32, #tpu.memory_space<vmem>>, %arg21: memref<1x3x256xf32, #tpu.memory_space<vmem>>, %arg22: memref<1x8x256xf32, #tpu.memory_space<vmem>>, %arg23: memref<1x1x8x128xf32, #tpu.memory_space<vmem>>) attributes {dimension_semantics = [#tpu.dimension_semantics<parallel>, #tpu.dimension_semantics<parallel>], iteration_bounds = array<i64: 2, 1>, scalar_prefetch = 0 : i64, scratch_operands = 0 : i64, tpu.core_type = #tpu.core_type<tc>, window_params = [{transform_indices = @transform_0, window_bounds = array<i64: 1, 3, 256>}, {transform_indices = @transform_1, window_bounds = array<i64: 1, 3, 256>}, {transform_indices = @transform_2, window_bounds = array<i64: 1, 18, 256>}, {transform_indices = @transform_3, window_bounds = array<i64: 1, 18, 256>}, {transform_indices = @transform_4, window_bounds = array<i64: 1, 8, 256>}, {transform_indices = @transform_5, window_bounds = array<i64: 1, 8, 256>}, {pipeline_mode = #tpu.pipeline_mode<synchronous>, transform_indices = @transform_6, window_bounds = array<i64: 32, 3>}, {pipeline_mode = #tpu.pipeline_mode<synchronous>, transform_indices = @transform_7, window_bounds = array<i64: 32, 3>}, {pipeline_mode = #tpu.pipeline_mode<synchronous>, transform_indices = @transform_8, window_bounds = array<i64: 32, 18>}, {pipeline_mode = #tpu.pipeline_mode<synchronous>, transform_indices = @transform_9, window_bounds = array<i64: 32, 18>}, {pipeline_mode = #tpu.pipeline_mode<synchronous>, transform_indices = @transform_10, window_bounds = array<i64: 32, 8>}, {pipeline_mode = #tpu.pipeline_mode<synchronous>, transform_indices = @transform_11, window_bounds = array<i64: 32, 8>}, {pipeline_mode = #tpu.pipeline_mode<synchronous>, transform_indices = @transform_12, window_bounds = array<i64: 32, 1>}, {pipeline_mode = #tpu.pipeline_mode<synchronous>, transform_indices = @transform_13, window_bounds = array<i64: 32, 32>}, {pipeline_mode = #tpu.pipeline_mode<synchronous>, transform_indices = @transform_14, window_bounds = array<i64: 32, 1>}, {pipeline_mode = #tpu.pipeline_mode<synchronous>, transform_indices = @transform_15, window_bounds = array<i64: 3, 32>}, {pipeline_mode = #tpu.pipeline_mode<synchronous>, transform_indices = @transform_16, window_bounds = array<i64: 3, 1>}, {pipeline_mode = #tpu.pipeline_mode<synchronous>, transform_indices = @transform_17, window_bounds = array<i64: 8, 32>}, {pipeline_mode = #tpu.pipeline_mode<synchronous>, transform_indices = @transform_18, window_bounds = array<i64: 8, 1>}, {transform_indices = @transform_19, window_bounds = array<i64: 1, 3, 256>}, {transform_indices = @transform_20, window_bounds = array<i64: 1, 8, 256>}, {transform_indices = @transform_21, window_bounds = array<i64: 1, 1, 8, 128>}]} {
    %c0 = arith.constant 0 : index
    %c0_0 = arith.constant 0 : index
    %0 = vector.load %arg8[%c0, %c0_0] : memref<32x3xf32, #tpu.memory_space<vmem>>, vector<32x3xf32>
    %c0_1 = arith.constant 0 : index
    %c0_2 = arith.constant 0 : index
    %c0_3 = arith.constant 0 : index
    %1 = vector.load %arg2[%c0_1, %c0_2, %c0_3] : memref<1x3x256xf32, #tpu.memory_space<vmem>>, vector<1x3x256xf32>
    %2 = vector.shape_cast %1 : vector<1x3x256xf32> to vector<3x256xf32>
    %cst = arith.constant dense<0.000000e+00> : vector<32x256xf32>
    %3 = tpu.matmul %0, %2, %cst {dimension_numbers = #tpu.dot_dimension_numbers<[1], [0], [0], [1], [0, 0, 1, 1], [], []>} : vector<32x3xf32>, vector<3x256xf32>, vector<32x256xf32> -> vector<32x256xf32>
    %c0_4 = arith.constant 0 : index
    %c0_5 = arith.constant 0 : index
    %4 = vector.load %arg9[%c0_4, %c0_5] : memref<32x3xf32, #tpu.memory_space<vmem>>, vector<32x3xf32>
    %c0_6 = arith.constant 0 : index
    %c0_7 = arith.constant 0 : index
    %c0_8 = arith.constant 0 : index
    %5 = vector.load %arg3[%c0_6, %c0_7, %c0_8] : memref<1x3x256xf32, #tpu.memory_space<vmem>>, vector<1x3x256xf32>
    %6 = vector.shape_cast %5 : vector<1x3x256xf32> to vector<3x256xf32>
    %cst_9 = arith.constant dense<0.000000e+00> : vector<32x256xf32>
    %7 = tpu.matmul %4, %6, %cst_9 {dimension_numbers = #tpu.dot_dimension_numbers<[1], [0], [0], [1], [0, 0, 1, 1], [], []>} : vector<32x3xf32>, vector<3x256xf32>, vector<32x256xf32> -> vector<32x256xf32>
    %8 = arith.addf %3, %7 : vector<32x256xf32>
    %c0_10 = arith.constant 0 : index
    %c0_11 = arith.constant 0 : index
    %9 = vector.load %arg10[%c0_10, %c0_11] : memref<32x18xf32, #tpu.memory_space<vmem>>, vector<32x18xf32>
    %c0_12 = arith.constant 0 : index
    %c0_13 = arith.constant 0 : index
    %c0_14 = arith.constant 0 : index
    %10 = vector.load %arg4[%c0_12, %c0_13, %c0_14] : memref<1x18x256xf32, #tpu.memory_space<vmem>>, vector<1x18x256xf32>
    %11 = vector.shape_cast %10 : vector<1x18x256xf32> to vector<18x256xf32>
    %cst_15 = arith.constant dense<0.000000e+00> : vector<32x256xf32>
    %12 = tpu.matmul %9, %11, %cst_15 {dimension_numbers = #tpu.dot_dimension_numbers<[1], [0], [0], [1], [0, 0, 1, 1], [], []>} : vector<32x18xf32>, vector<18x256xf32>, vector<32x256xf32> -> vector<32x256xf32>
    %13 = arith.addf %8, %12 : vector<32x256xf32>
    %c0_16 = arith.constant 0 : index
    %c0_17 = arith.constant 0 : index
    %14 = vector.load %arg11[%c0_16, %c0_17] : memref<32x18xf32, #tpu.memory_space<vmem>>, vector<32x18xf32>
    %c0_18 = arith.constant 0 : index
    %c0_19 = arith.constant 0 : index
    %c0_20 = arith.constant 0 : index
    %15 = vector.load %arg5[%c0_18, %c0_19, %c0_20] : memref<1x18x256xf32, #tpu.memory_space<vmem>>, vector<1x18x256xf32>
    %16 = vector.shape_cast %15 : vector<1x18x256xf32> to vector<18x256xf32>
    %cst_21 = arith.constant dense<0.000000e+00> : vector<32x256xf32>
    %17 = tpu.matmul %14, %16, %cst_21 {dimension_numbers = #tpu.dot_dimension_numbers<[1], [0], [0], [1], [0, 0, 1, 1], [], []>} : vector<32x18xf32>, vector<18x256xf32>, vector<32x256xf32> -> vector<32x256xf32>
    %18 = arith.addf %13, %17 : vector<32x256xf32>
    %c0_22 = arith.constant 0 : index
    %c0_23 = arith.constant 0 : index
    %19 = vector.load %arg12[%c0_22, %c0_23] : memref<32x8xf32, #tpu.memory_space<vmem>>, vector<32x8xf32>
    %c0_24 = arith.constant 0 : index
    %c0_25 = arith.constant 0 : index
    %c0_26 = arith.constant 0 : index
    %20 = vector.load %arg6[%c0_24, %c0_25, %c0_26] : memref<1x8x256xf32, #tpu.memory_space<vmem>>, vector<1x8x256xf32>
    %21 = vector.shape_cast %20 : vector<1x8x256xf32> to vector<8x256xf32>
    %cst_27 = arith.constant dense<0.000000e+00> : vector<32x256xf32>
    %22 = tpu.matmul %19, %21, %cst_27 {dimension_numbers = #tpu.dot_dimension_numbers<[1], [0], [0], [1], [0, 0, 1, 1], [], []>} : vector<32x8xf32>, vector<8x256xf32>, vector<32x256xf32> -> vector<32x256xf32>
    %23 = arith.addf %18, %22 : vector<32x256xf32>
    %c0_28 = arith.constant 0 : index
    %c0_29 = arith.constant 0 : index
    %24 = vector.load %arg13[%c0_28, %c0_29] : memref<32x8xf32, #tpu.memory_space<vmem>>, vector<32x8xf32>
    %c0_30 = arith.constant 0 : index
    %c0_31 = arith.constant 0 : index
    %c0_32 = arith.constant 0 : index
    %25 = vector.load %arg7[%c0_30, %c0_31, %c0_32] : memref<1x8x256xf32, #tpu.memory_space<vmem>>, vector<1x8x256xf32>
    %26 = vector.shape_cast %25 : vector<1x8x256xf32> to vector<8x256xf32>
    %cst_33 = arith.constant dense<0.000000e+00> : vector<32x256xf32>
    %27 = tpu.matmul %24, %26, %cst_33 {dimension_numbers = #tpu.dot_dimension_numbers<[1], [0], [0], [1], [0, 0, 1, 1], [], []>} : vector<32x8xf32>, vector<8x256xf32>, vector<32x256xf32> -> vector<32x256xf32>
    %28 = arith.addf %23, %27 : vector<32x256xf32>
    %c0_34 = arith.constant 0 : index
    %c0_35 = arith.constant 0 : index
    %29 = vector.load %arg14[%c0_34, %c0_35] : memref<32x1xf32, #tpu.memory_space<vmem>>, vector<32x1xf32>
    %30 = vector.broadcast %29 : vector<32x1xf32> to vector<32x256xf32>
    %31 = arith.addf %28, %30 : vector<32x256xf32>
    %cst_36 = arith.constant 0.000000e+00 : f32
    %32 = vector.broadcast %cst_36 : f32 to vector<32x256xf32>
    %33 = arith.maximumf %31, %32 : vector<32x256xf32>
    %c0_37 = arith.constant 0 : index
    %c0_38 = arith.constant 0 : index
    %34 = vector.load %arg15[%c0_37, %c0_38] : memref<32x32xf32, #tpu.memory_space<vmem>>, vector<32x32xf32>
    %cst_39 = arith.constant dense<0.000000e+00> : vector<32x256xf32>
    %35 = tpu.matmul %34, %33, %cst_39 {dimension_numbers = #tpu.dot_dimension_numbers<[1], [0], [0], [1], [0, 0, 1, 1], [], []>} : vector<32x32xf32>, vector<32x256xf32>, vector<32x256xf32> -> vector<32x256xf32>
    %c0_40 = arith.constant 0 : index
    %c0_41 = arith.constant 0 : index
    %36 = vector.load %arg16[%c0_40, %c0_41] : memref<32x1xf32, #tpu.memory_space<vmem>>, vector<32x1xf32>
    %37 = vector.broadcast %36 : vector<32x1xf32> to vector<32x256xf32>
    %38 = arith.addf %35, %37 : vector<32x256xf32>
    %cst_42 = arith.constant 0.000000e+00 : f32
    %39 = vector.broadcast %cst_42 : f32 to vector<32x256xf32>
    %40 = arith.maximumf %38, %39 : vector<32x256xf32>
    %c0_43 = arith.constant 0 : index
    %c0_44 = arith.constant 0 : index
    %41 = vector.load %arg17[%c0_43, %c0_44] : memref<3x32xf32, #tpu.memory_space<vmem>>, vector<3x32xf32>
    %cst_45 = arith.constant dense<0.000000e+00> : vector<3x256xf32>
    %42 = tpu.matmul %41, %40, %cst_45 {dimension_numbers = #tpu.dot_dimension_numbers<[1], [0], [0], [1], [0, 0, 1, 1], [], []>} : vector<3x32xf32>, vector<32x256xf32>, vector<3x256xf32> -> vector<3x256xf32>
    %c0_46 = arith.constant 0 : index
    %c0_47 = arith.constant 0 : index
    %43 = vector.load %arg18[%c0_46, %c0_47] : memref<3x1xf32, #tpu.memory_space<vmem>>, vector<3x1xf32>
    %44 = vector.broadcast %43 : vector<3x1xf32> to vector<3x256xf32>
    %45 = arith.addf %42, %44 : vector<3x256xf32>
    %46 = math.tanh %45 : vector<3x256xf32>
    %c0_48 = arith.constant 0 : index
    %c0_49 = arith.constant 0 : index
    %c0_50 = arith.constant 0 : index
    %47 = vector.load %arg21[%c0_48, %c0_49, %c0_50] : memref<1x3x256xf32, #tpu.memory_space<vmem>>, vector<1x3x256xf32>
    %48 = vector.shape_cast %47 : vector<1x3x256xf32> to vector<3x256xf32>
    %49 = vector.shape_cast %46 : vector<3x256xf32> to vector<1x3x256xf32>
    tpu.vector_store %arg21[%c0_48, %c0_49, %c0_50], %49 {strides = array<i32>} : memref<1x3x256xf32, #tpu.memory_space<vmem>>, vector<1x3x256xf32>,
    %c0_51 = arith.constant 0 : index
    %c0_52 = arith.constant 0 : index
    %50 = vector.load %arg19[%c0_51, %c0_52] : memref<8x32xf32, #tpu.memory_space<vmem>>, vector<8x32xf32>
    %cst_53 = arith.constant dense<0.000000e+00> : vector<8x256xf32>
    %51 = tpu.matmul %50, %40, %cst_53 {dimension_numbers = #tpu.dot_dimension_numbers<[1], [0], [0], [1], [0, 0, 1, 1], [], []>} : vector<8x32xf32>, vector<32x256xf32>, vector<8x256xf32> -> vector<8x256xf32>
    %c0_54 = arith.constant 0 : index
    %c0_55 = arith.constant 0 : index
    %52 = vector.load %arg20[%c0_54, %c0_55] : memref<8x1xf32, #tpu.memory_space<vmem>>, vector<8x1xf32>
    %53 = vector.broadcast %52 : vector<8x1xf32> to vector<8x256xf32>
    %54 = arith.addf %51, %53 : vector<8x256xf32>
    %cst_56 = arith.constant dense<0xFF800000> : vector<256xf32>
    %55 = vector.multi_reduction <maximumf>, %54, %cst_56 [0] : vector<8x256xf32> to vector<256xf32>
    %56 = vector.shape_cast %55 : vector<256xf32> to vector<1x256xf32>
    %57 = vector.broadcast %56 : vector<1x256xf32> to vector<8x256xf32>
    %58 = arith.subf %54, %57 : vector<8x256xf32>
    %59 = math.exp %58 : vector<8x256xf32>
    %cst_57 = arith.constant dense<0.000000e+00> : vector<256xf32>
    %60 = vector.multi_reduction <add>, %59, %cst_57 [0] : vector<8x256xf32> to vector<256xf32>
    %61 = vector.shape_cast %60 : vector<256xf32> to vector<1x256xf32>
    %62 = tpu.reciprocal %61 {approx = true} : vector<1x256xf32> -> vector<1x256xf32>
    %63 = vector.broadcast %62 : vector<1x256xf32> to vector<8x256xf32>
    %64 = arith.mulf %59, %63 : vector<8x256xf32>
    %c0_58 = arith.constant 0 : index
    %c0_59 = arith.constant 0 : index
    %c0_60 = arith.constant 0 : index
    %65 = vector.load %arg22[%c0_58, %c0_59, %c0_60] : memref<1x8x256xf32, #tpu.memory_space<vmem>>, vector<1x8x256xf32>
    %66 = vector.shape_cast %65 : vector<1x8x256xf32> to vector<8x256xf32>
    %67 = vector.shape_cast %64 : vector<8x256xf32> to vector<1x8x256xf32>
    tpu.vector_store %arg22[%c0_58, %c0_59, %c0_60], %67 {strides = array<i32>} : memref<1x8x256xf32, #tpu.memory_space<vmem>>, vector<1x8x256xf32>,
    %68 = arith.mulf %40, %40 : vector<32x256xf32>
    %69 = vector.shape_cast %68 : vector<32x256xf32> to vector<1x32x256xf32>
    %cst_61 = arith.constant dense<0.000000e+00> : vector<1xf32>
    %70 = vector.multi_reduction <add>, %69, %cst_61 [1, 2] : vector<1x32x256xf32> to vector<1xf32>
    %71 = vector.shape_cast %70 : vector<1xf32> to vector<1x1x1xf32>
    %72 = vector.extract %71[0, 0, 0] : f32 from vector<1x1x1xf32>
    %73 = vector.broadcast %72 : f32 to vector<1x1x8x128xf32>
    %c0_62 = arith.constant 0 : index
    %c0_63 = arith.constant 0 : index
    %c0_64 = arith.constant 0 : index
    %c0_65 = arith.constant 0 : index
    %74 = vector.load %arg23[%c0_62, %c0_63, %c0_64, %c0_65] : memref<1x1x8x128xf32, #tpu.memory_space<vmem>>, vector<1x1x8x128xf32>
    tpu.vector_store %arg23[%c0_62, %c0_63, %c0_64, %c0_65], %73 {strides = array<i32>} : memref<1x1x8x128xf32, #tpu.memory_space<vmem>>, vector<1x1x8x128xf32>,
    return
  }
  func.func @transform_0(%arg0: i32, %arg1: i32) -> (i32, i32, i32) {
    %c0_i32 = arith.constant 0 : i32
    %c0_i32_0 = arith.constant 0 : i32
    return %arg0, %c0_i32, %arg1 : i32, i32, i32
  }
  func.func @transform_1(%arg0: i32, %arg1: i32) -> (i32, i32, i32) {
    %c0_i32 = arith.constant 0 : i32
    %c0_i32_0 = arith.constant 0 : i32
    return %arg0, %c0_i32, %arg1 : i32, i32, i32
  }
  func.func @transform_2(%arg0: i32, %arg1: i32) -> (i32, i32, i32) {
    %c0_i32 = arith.constant 0 : i32
    %c0_i32_0 = arith.constant 0 : i32
    return %arg0, %c0_i32, %arg1 : i32, i32, i32
  }
  func.func @transform_3(%arg0: i32, %arg1: i32) -> (i32, i32, i32) {
    %c0_i32 = arith.constant 0 : i32
    %c0_i32_0 = arith.constant 0 : i32
    return %arg0, %c0_i32, %arg1 : i32, i32, i32
  }
  func.func @transform_4(%arg0: i32, %arg1: i32) -> (i32, i32, i32) {
    %c0_i32 = arith.constant 0 : i32
    %c0_i32_0 = arith.constant 0 : i32
    return %arg0, %c0_i32, %arg1 : i32, i32, i32
  }
  func.func @transform_5(%arg0: i32, %arg1: i32) -> (i32, i32, i32) {
    %c0_i32 = arith.constant 0 : i32
    %c0_i32_0 = arith.constant 0 : i32
    return %arg0, %c0_i32, %arg1 : i32, i32, i32
  }
  func.func @transform_6(%arg0: i32, %arg1: i32) -> (i32, i32) {
    %c0_i32 = arith.constant 0 : i32
    %c0_i32_0 = arith.constant 0 : i32
    %c0_i32_1 = arith.constant 0 : i32
    return %c0_i32, %c0_i32_0 : i32, i32
  }
  func.func @transform_7(%arg0: i32, %arg1: i32) -> (i32, i32) {
    %c0_i32 = arith.constant 0 : i32
    %c0_i32_0 = arith.constant 0 : i32
    %c0_i32_1 = arith.constant 0 : i32
    return %c0_i32, %c0_i32_0 : i32, i32
  }
  func.func @transform_8(%arg0: i32, %arg1: i32) -> (i32, i32) {
    %c0_i32 = arith.constant 0 : i32
    %c0_i32_0 = arith.constant 0 : i32
    %c0_i32_1 = arith.constant 0 : i32
    return %c0_i32, %c0_i32_0 : i32, i32
  }
  func.func @transform_9(%arg0: i32, %arg1: i32) -> (i32, i32) {
    %c0_i32 = arith.constant 0 : i32
    %c0_i32_0 = arith.constant 0 : i32
    %c0_i32_1 = arith.constant 0 : i32
    return %c0_i32, %c0_i32_0 : i32, i32
  }
  func.func @transform_10(%arg0: i32, %arg1: i32) -> (i32, i32) {
    %c0_i32 = arith.constant 0 : i32
    %c0_i32_0 = arith.constant 0 : i32
    %c0_i32_1 = arith.constant 0 : i32
    return %c0_i32, %c0_i32_0 : i32, i32
  }
  func.func @transform_11(%arg0: i32, %arg1: i32) -> (i32, i32) {
    %c0_i32 = arith.constant 0 : i32
    %c0_i32_0 = arith.constant 0 : i32
    %c0_i32_1 = arith.constant 0 : i32
    return %c0_i32, %c0_i32_0 : i32, i32
  }
  func.func @transform_12(%arg0: i32, %arg1: i32) -> (i32, i32) {
    %c0_i32 = arith.constant 0 : i32
    %c0_i32_0 = arith.constant 0 : i32
    %c0_i32_1 = arith.constant 0 : i32
    return %c0_i32, %c0_i32_0 : i32, i32
  }
  func.func @transform_13(%arg0: i32, %arg1: i32) -> (i32, i32) {
    %c0_i32 = arith.constant 0 : i32
    %c0_i32_0 = arith.constant 0 : i32
    %c0_i32_1 = arith.constant 0 : i32
    return %c0_i32, %c0_i32_0 : i32, i32
  }
  func.func @transform_14(%arg0: i32, %arg1: i32) -> (i32, i32) {
    %c0_i32 = arith.constant 0 : i32
    %c0_i32_0 = arith.constant 0 : i32
    %c0_i32_1 = arith.constant 0 : i32
    return %c0_i32, %c0_i32_0 : i32, i32
  }
  func.func @transform_15(%arg0: i32, %arg1: i32) -> (i32, i32) {
    %c0_i32 = arith.constant 0 : i32
    %c0_i32_0 = arith.constant 0 : i32
    %c0_i32_1 = arith.constant 0 : i32
    return %c0_i32, %c0_i32_0 : i32, i32
  }
  func.func @transform_16(%arg0: i32, %arg1: i32) -> (i32, i32) {
    %c0_i32 = arith.constant 0 : i32
    %c0_i32_0 = arith.constant 0 : i32
    %c0_i32_1 = arith.constant 0 : i32
    return %c0_i32, %c0_i32_0 : i32, i32
  }
  func.func @transform_17(%arg0: i32, %arg1: i32) -> (i32, i32) {
    %c0_i32 = arith.constant 0 : i32
    %c0_i32_0 = arith.constant 0 : i32
    %c0_i32_1 = arith.constant 0 : i32
    return %c0_i32, %c0_i32_0 : i32, i32
  }
  func.func @transform_18(%arg0: i32, %arg1: i32) -> (i32, i32) {
    %c0_i32 = arith.constant 0 : i32
    %c0_i32_0 = arith.constant 0 : i32
    %c0_i32_1 = arith.constant 0 : i32
    return %c0_i32, %c0_i32_0 : i32, i32
  }
  func.func @transform_19(%arg0: i32, %arg1: i32) -> (i32, i32, i32) {
    %c0_i32 = arith.constant 0 : i32
    %c0_i32_0 = arith.constant 0 : i32
    return %arg0, %c0_i32, %arg1 : i32, i32, i32
  }
  func.func @transform_20(%arg0: i32, %arg1: i32) -> (i32, i32, i32) {
    %c0_i32 = arith.constant 0 : i32
    %c0_i32_0 = arith.constant 0 : i32
    return %arg0, %c0_i32, %arg1 : i32, i32, i32
  }
  func.func @transform_21(%arg0: i32, %arg1: i32) -> (i32, i32, i32, i32) {
    %c0_i32 = arith.constant 0 : i32
    %c0_i32_0 = arith.constant 0 : i32
    %c0_i32_1 = arith.constant 0 : i32
    return %arg0, %arg1, %c0_i32, %c0_i32_0 : i32, i32, i32, i32
  }
}

</mosaic_0001>

<bundles_post_ra>
// kernel: tpu_custom_call.1
= control target key start
LH: loop header
LB: loop body
LE: loop exit
PB: predicated region body
PF: predicated region fallthrough
CT: control target
= control target key end

     0   :  { %s2779_s0 = inlined_call_operand.vmem [shape: f32[2,3,256], index: 0, kind: input, shape index: {}]   ;;  %s2780_s1 = inlined_call_operand.vmem [shape: f32[2,3,256], index: 1, kind: input, shape index: {}]   ;;  %s2781_s2 = inlined_call_operand.vmem [shape: f32[2,18,256], index: 2, kind: input, shape index: {}]   ;;  %s2782_s3 = inlined_call_operand.vmem [shape: f32[2,18,256], index: 3, kind: input, shape index: {}]   ;;  %s2783_s4 = inlined_call_operand.vmem [shape: f32[2,8,256], index: 4, kind: input, shape index: {}]   ;;  %s2784_s5 = inlined_call_operand.vmem [shape: f32[2,8,256], index: 5, kind: input, shape index: {}]   ;;  %s2785_s6 = inlined_call_operand.vmem [shape: f32[32,3], index: 6, kind: input, shape index: {}]   ;;  %s2786_s7 = inlined_call_operand.vmem [shape: f32[32,3], index: 7, kind: input, shape index: {}]   ;;  %s2787_s8 = inlined_call_operand.vmem [shape: f32[32,18], index: 8, kind: input, shape index: {}]   ;;  %s2788_s9 = inlined_call_operand.vmem [shape: f32[32,18], index: 9, kind: input, shape index: {}]   ;;  %s2789_s10 = inlined_call_operand.vmem [shape: f32[32,8], index: 10, kind: input, shape index: {}]   ;;  %s2790_s11 = inlined_call_operand.vmem [shape: f32[32,8], index: 11, kind: input, shape index: {}]   ;;  %s2791_s12 = inlined_call_operand.vmem [shape: f32[32,1], index: 12, kind: input, shape index: {}]   ;;  %s2792_s13 = inlined_call_operand.vmem [shape: f32[32,32], index: 13, kind: input, shape index: {}]   ;;  %s2793_s14 = inlined_call_operand.vmem [shape: f32[32,1], index: 14, kind: input, shape index: {}]   ;;  %s2794_s15 = inlined_call_operand.vmem [shape: f32[3,32], index: 15, kind: input, shape index: {}]   ;;  %s2795_s16 = inlined_call_operand.vmem [shape: f32[3,1], index: 16, kind: input, shape index: {}]   ;;  %s2796_s17 = inlined_call_operand.vmem [shape: f32[8,32], index: 17, kind: input, shape index: {}]   ;;  %s2797_s18 = inlined_call_operand.vmem [shape: f32[8,1], index: 18, kind: input, shape index: {}]   ;;  %s2798_s19 = inlined_call_operand.vmem [shape: f32[2,3,256], index: 19, kind: output, shape index: {0}]   ;;  %s2799_s20 = inlined_call_operand.hbm [shape: f32[2,8,256], index: 20, kind: output, shape index: {1}]   ;;  %s2800_s21 = inlined_call_operand.hbm [shape: f32[2,1,8,128], index: 21, kind: output, shape index: {2}]  }
   0x1   :  { %2812 = sst [smem:[#allocation16_spill]] %s2779_s0 }
   0x2   :  { %2813 = sst [smem:[#allocation17_spill]] %s2780_s1 }
   0x3   :  { %2814 = sst [smem:[#allocation18_spill]] %s2781_s2 }
   0x4   :  { %2815 = sst [smem:[#allocation19_spill]] %s2782_s3 }
   0x5   :  { %2816 = sst [smem:[#allocation20_spill]] %s2783_s4 }
   0x6   :  { %2817 = sst [smem:[#allocation21_spill]] %s2784_s5 }
   0x7   :  { %2818 = sst [smem:[#allocation22_spill]] %s2785_s6 }
   0x8   :  { %2819 = sst [smem:[#allocation23_spill]] %s2786_s7 }
   0x9   :  { %2820 = sst [smem:[#allocation24_spill]] %s2787_s8 }
   0xa   :  { %2821 = sst [smem:[#allocation25_spill]] %s2788_s9 }
   0xb   :  { %2822 = sst [smem:[#allocation26_spill]] %s2789_s10 }
   0xc   :  { %2823 = sst [smem:[#allocation27_spill]] %s2799_s20 }
   0xd   :  { %2824 = sst [smem:[#allocation28_spill]] %s2800_s21 }
   0xe   :  { %27 = vsyncpa [#allocation3], 0 }
   0xf   :  { %29 = vsyncpa [#allocation3 + $0x1], 0 }
  0x10   :  { %30 = vsyncpa [#allocation5], 0 }
  0x11   :  { %32 = vsyncpa [#allocation5 + $0x1], 0  ;;  %s2440_s2 = smov 0   ;;  %s2442_s25 = smov 0  }
  0x12   :  { %s2444_s26 = smov 0   ;;  %s2446_s27 = smov 0  }
  0x13   :  { %s2448_s3 = smov 0   ;;  %s2450_s28 = smov 0  }
  0x14 LB: > { %2825 = sst [smem:[#allocation8_spill]] %s2307_s2  ;;  %s2036_s29 = sadd.s32 4294967295, %s2327_s28   ;;  %s2327_s28 = sphi %s2450_s28, %s38_s28   ;;  %s2323_s3 = sphi %s2448_s3, %s2856_s3   ;;  %s2319_s27 = sphi %s2446_s27, %s2855_s27   ;;  %s2315_s26 = sphi %s2444_s26, %s2854_s26   ;;  %s2311_s25 = sphi %s2442_s25, %s2858_s25   ;;  %s2307_s2 = sphi %s2440_s2, %s2857_s2  }
  0x15   : > { %2826 = sst [smem:[#allocation9_spill]] %s2315_s26  ;;  %s2037_s0 = sadd.s32 4294967294, %s2327_s28  }
  0x16   : > { %2827 = sst [smem:[#allocation10_spill]] %s2323_s3  ;;  %s50_s4 = sadd.s32 1, %s2323_s3 }
  0x17   : > { %2828 = sst [smem:[#allocation11_spill]] %s2327_s28  ;;  %s528_s30 = sadd.s32 1, %s2315_s26 }
  0x18   : > { %p52_p0 = scmp.ge.s32.totalorder %s50_s4, 2  ;;  %p538_p1 = scmp.ne.s32.totalorder %s2315_s26, %s2311_s25 }
  0x19   : > { %p539_p2 = scmp.eq.s32.totalorder %s2036_s29, 1  ;;  %p544_p3 = scmp.ne.s32.totalorder %s2311_s25, %s2307_s2 }
  0x1a   : > { %s2860_s4 = smov (%p52_p0, %s50_s4), 0  ;;  %p545_p5 = scmp.eq.s32.totalorder %s2037_s0, 1 }
  0x1b   : > { %2829 = sst [smem:[#allocation12_spill]] %s2860_s4  ;;  %p2480_p4 = por %p539_p2, %p538_p1 }
  0x1c   : > { %s523_s22 = ssub.s32 %s2323_s3, %s2860_s4  ;;  %p2040_p6 = scmp.ge.s32.totalorder %s2327_s28, 1 }
  0x1d   : > { %s2830_s5 = scalar_select %p2480_p4, 1, 0 }
  0x1e   : > { %p526_p7 = scmp.eq.s32.totalorder %s523_s22, 0  ;;  %p2487_p8 = por %p545_p5, %p544_p3 }
  0x1f   : > { %2831 = sst [smem:[#allocation13_spill]] %s2830_s5  ;;  %p708_p9 = scmp.lt.s32.totalorder %s2327_s28, 3 }
  0x20   : > { %s2832_s23 = scalar_select %p2487_p8, 1, 0 }
  0x21   : > { %s2493_s1 = scalar_select %p526_p7, %s2315_s26, %s528_s30  }
  0x22   : > { %2833 = sst [smem:[#allocation14_spill]] %s2832_s23  ;;  %p709_p10 = pnand %p2040_p6, %p708_p9 }
  0x23   : > { %2834 = sst [smem:[#allocation15_spill]] %s2493_s1  ;;  %p832_p11 = scmp.lt.s32.totalorder (!%p709_p10), %s2319_s27, 1 }
  0x24   : > { %712 = sbr.rel (%p709_p10) target bundleno = 653 (0x28d), region = 96  ;;  %s2835_s4 = sld [smem:[#allocation17_spill]] (!%p709_p10) }
  0x25   : > { %s2836_s26 = sld [smem:[#allocation16_spill]] (!%p709_p10) }
  0x26   : > { %s2837_s7 = sld [smem:[#allocation23_spill]] (!%p709_p10) }
  0x27   : > { %s2838_s0 = sld [smem:[#allocation18_spill]] (!%p709_p10) }
  0x28   : > { %s2839_s6 = sld [smem:[#allocation22_spill]] (!%p709_p10) }
  0x29   : > { %s2497_s24 = scalar_select %p832_p11, %s2319_s27, 1  ;;  %vm929_vm0 = vcmask 1042432   ;;  %vm916_vm1 = vcmask 23552   ;;  %vm1093_vm2 = vcmask 1041408   ;;  %vm1080_vm3 = vcmask 146432   ;;  %v1430_v36 = vld [vmem:[%s2791_s12 + $0x8] sm:$0xff] }
  0x2a   : > { %s2840_s1 = sld [smem:[#allocation19_spill]]  ;;  %v1432_v37 = vld [vmem:[%s2791_s12 + $0x18] sm:$0xff]  ;;  %v2329_v38 = vmov 0   ;;  %vm1266_vm4 = vcmask 64512   ;;  %v1429_v41 = vld [vmem:[%s2791_s12] sm:$0xff]  ;;  %v1431_v42 = vld [vmem:[%s2791_s12 + $0x10] sm:$0xff] }
  0x2b   : > { %s2500_s29 = sshll.u32 %s2497_s24, 3  ;;  %s2138_s2 = smul.u32 48, %s2497_s24  ;;  %2203 = vset.pattern.permute.xlu1 %v2329_v38  ;;  %2202 = vset.pattern.permute.xlu0 %v2329_v38  ;;  %v1474_v45 = vld [vmem:[%s2793_s14 + $0x8] sm:$0xff]  ;;  %v1473_v46 = vld [vmem:[%s2793_s14] sm:$0xff]  ;;  %v1347_v53 = vld [vmem:[%s2790_s11 + $0x10] sm:$0xff]  ;;  %vm1497_vm5 = vcmask 261120  }
  0x2c   : > { %s849_s3 = scalar_lea.vmem %s2835_s4, %s2500_s29  ;;  %s839_s23 = scalar_lea.vmem %s2836_s26, %s2500_s29  ;;  %v907_v2 = vld [vmem:[%s2837_s7] sm:$0xff]  ;;  %v910_v3 = vld [vmem:[%s2837_s7 + $0x18] sm:$0xff]  ;;  %v908_v10 = vld [vmem:[%s2837_s7 + $0x8] sm:$0xff]  ;;  %1440 = vperm.xlu1 %2203, %v1430_v36   ;;  %1450 = vperm.xlu0 %2202, %v1432_v37   ;;  %vm1631_vm6 = vcmask 1043456  }
  0x2d   : > { %v911_v0 = vld [vmem:[%s849_s3] sm:$0x77]  ;;  %s859_s22 = scalar_lea.vmem %s2838_s0, %s2138_s2  ;;  %v909_v22 = vld [vmem:[%s2837_s7 + $0x10] sm:$0xff]  ;;  %s2841_s26 = sld [smem:[#allocation20_spill]]  ;;  %2204 = vset.pattern.permute.xlu2 %v2329_v38  ;;  %v1346_v52 = vld [vmem:[%s2790_s11 + $0x8] sm:$0xff] }
  0x2e   : > { %913 = vst [vmem:[#allocation1] ss:$2 sm:$0xff] %v911_v0  ;;  %v906_v1 = vld [vmem:[%s839_s23] sm:$0x77]  ;;  %v1079_v7 = vld [vmem:[%s859_s22 + $0x28] sm:$0x3] }
  0x2f   : > { %v1078_v6 = vld [vmem:[%s859_s22 + $0x20] sm:$0x3]  ;;  %v1076_v8 = vld [vmem:[%s859_s22 + $0x10] sm:$0xff]  ;;  %v1077_v9 = vld [vmem:[%s859_s22 + $0x18] sm:$0xff]  ;;  %s2842_s8 = sld [smem:[#allocation24_spill]]  ;;  %s2127_s3 = sshll.u32 %s2319_s27, 3 }
  0x30   : > { %v902_v11 = vld [vmem:[%s2839_s6] sm:$0xff]  ;;  %v1075_v13 = vld [vmem:[%s859_s22 + $0x8] sm:$0xff]  ;;  %s869_s30 = scalar_lea.vmem %s2840_s1, %s2138_s2  ;;  %s2132_s2 = sshll.u32 %s2497_s24, 4  ;;  %v904_v26 = vld [vmem:[%s2839_s6 + $0x10] sm:$0xff] }
  0x31   : > { %v1074_v12 = vld [vmem:[%s859_s22] sm:$0xff]  ;;  %v1175_v17 = vld [vmem:[%s869_s30 + $0x28] sm:$0x3]  ;;  %v1172_v18 = vld [vmem:[%s869_s30 + $0x10] sm:$0xff]  ;;  %s2843_s21 = sld [smem:[#allocation21_spill]] }
  0x32   : > { %v1174_v16 = vld [vmem:[%s869_s30 + $0x20] sm:$0x3]  ;;  %v1173_v19 = vld [vmem:[%s869_s30 + $0x18] sm:$0xff]  ;;  %v1171_v21 = vld [vmem:[%s869_s30 + $0x8] sm:$0xff]  ;;  %s2844_s9 = sld [smem:[#allocation25_spill]] }
  0x33   : > { %v1170_v20 = vld [vmem:[%s869_s30] sm:$0xff]  ;;  %v903_v23 = vld [vmem:[%s2839_s6 + $0x8] sm:$0xff]  ;;  %s879_s28 = scalar_lea.vmem %s2841_s26, %s2132_s2  ;;  %v905_v28 = vld [vmem:[%s2839_s6 + $0x18] sm:$0xff]  ;;  %s2845_s10 = sld [smem:[#allocation26_spill]] }
  0x34   : > { %v1264_v24 = vld [vmem:[%s879_s28] sm:$0xff]  ;;  %v1265_v25 = vld [vmem:[%s879_s28 + $0x8] sm:$0xff]  ;;  %1435 = vperm.xlu1 %2203, %v1429_v41   ;;  %1445 = vperm.xlu0 %2202, %v1431_v42   ;;  %v1348_v54 = vld [vmem:[%s2790_s11 + $0x18] sm:$0xff]  ;;  %s899_s30 = scalar_lea.vmem %s2798_s19, %s2500_s29  ;;  %s2723_s29 = sand.u32 1, %s2311_s25  }
  0x35   : > { %v914_v4 = vld.sshfl [vmem:[#allocation1] sm:$0xff pattern:$0x75316420]  ;;  %v915_v5 = vld.sshfl [vmem:[#allocation1 + $0x8] sm:$0xff pattern:$0x75316420] }
  0x36   : > { %2055 = vmatpush.msk.msra.mxu0 %vm929_vm0, %v914_v4  ;;  %2136 = vmatpush.msk.msra.mxu2 %vm929_vm0, %v914_v4  ;;  %993 = vst [vmem:[#allocation1] ss:$2 sm:$0xff] %v906_v1  ;;  %v1070_v27 = vld [vmem:[%s2842_s8] sm:$0xff]  ;;  %v1071_v29 = vld [vmem:[%s2842_s8 + $0x8] sm:$0xff]  ;;  %v1072_v32 = vld [vmem:[%s2842_s8 + $0x10] sm:$0xff]  ;;  %s2042_s4 = sshll.u32 %s2723_s29, 3 }
  0x37   : > { %2060 = vmatpush.msk.msra.mxu1 %vm929_vm0, %v915_v5  ;;  %2137 = vmatpush.msk.msra.mxu3 %vm929_vm0, %v915_v5  ;;  %s889_s26 = scalar_lea.vmem %s2843_s21, %s2132_s2  ;;  %v1073_v34 = vld [vmem:[%s2842_s8 + $0x18] sm:$0xff]  ;;  %v1345_v48 = vld [vmem:[%s2790_s11] sm:$0xff]  ;;  %s2846_s20 = sld [smem:[#allocation28_spill]] }
  0x38   : > { %2056 = vmatmul.msk.f32.vlgmr.msra.gmra.mxu0 %vm916_vm1, %v907_v2  ;;  %2059 = vmatmul.msk.f32.vlgmr.msra.gmra.mxu2 %vm916_vm1, %v910_v3  ;;  %v1349_v30 = vld [vmem:[%s889_s26] sm:$0xff]  ;;  %v1350_v31 = vld [vmem:[%s889_s26 + $0x8] sm:$0xff]  ;;  %v1168_v39 = vld [vmem:[%s2844_s9 + $0x10] sm:$0xff]  ;;  %s830_s26 = scalar_lea.vmem [#allocation4], %s2042_s4  ;;  %s2041_s5 = sshll.u32 %s2723_s29, 4 }
  0x39   : > { %2061 = vmatmul.msk.f32.vlgmr.msra.gmra.mxu1 %vm916_vm1, %v907_v2  ;;  %2064 = vmatmul.msk.f32.vlgmr.msra.gmra.mxu3 %vm916_vm1, %v910_v3  ;;  %v1166_v33 = vld [vmem:[%s2844_s9] sm:$0xff]  ;;  %v1167_v35 = vld [vmem:[%s2844_s9 + $0x8] sm:$0xff]  ;;  %v1169_v43 = vld [vmem:[%s2844_s9 + $0x18] sm:$0xff]  ;;  %s1796_s28 = sshll.u32 %s830_s26, 4  ;;  %s2135_s2 = sshll.u32 %s2319_s27, 4  ;;  %s1797_s28 = int_to_ptr.vmem [resolvable:$true] %s1796_s28 }
  0x3a   : > { %2075 = vmatpush.msk.msrb.mxu0 %vm1093_vm2, %v1078_v6  ;;  %2080 = vmatpush.msk.msrb.mxu1 %vm1093_vm2, %v1079_v7  ;;  %v1260_v40 = vld [vmem:[%s2845_s10] sm:$0xff]  ;;  %v1261_v44 = vld [vmem:[%s2845_s10 + $0x8] sm:$0xff]  ;;  %v1262_v47 = vld [vmem:[%s2845_s10 + $0x10] sm:$0xff]  ;;  %s1762_s6 = scalar_lea.sflag [#allocation5], %s2723_s29 }
  0x3b   : > { %v1636_v49 = vld [vmem:[%s2797_s18] sm:$0xff]  ;;  %v1263_v51 = vld [vmem:[%s2845_s10 + $0x18] sm:$0xff] }
  0x3c   : > { %1114 = vmatpush.msrb.mxu0 %v1076_v8  ;;  %1143 = vmatpush.msrb.mxu1 %v1077_v9  ;;  %v1577_v50 = vld [vmem:[%s2795_s16] sm:$0x7] }
  0x3d   : > { %v994_v14 = vld.sshfl [vmem:[#allocation1] sm:$0xff pattern:$0x75316420]  ;;  %v995_v15 = vld.sshfl [vmem:[#allocation1 + $0x8] sm:$0xff pattern:$0x75316420]  ;;  %1484 = vperm.xlu0 %2202, %v1474_v45   ;;  %1479 = vperm.xlu1 %2203, %v1473_v46   ;;  %s1794_s21 = scalar_lea.hbm %s2846_s20, %s2127_s3 }
  0x3e   : > { %2065 = vmatpush.msk.msrb.mxu2 %vm929_vm0, %v994_v14  ;;  %2070 = vmatpush.msk.msrb.mxu3 %vm929_vm0, %v995_v15  ;;  %s1798_s24 = sshll.u32 %s1794_s21, 4  ;;  %s2848_s3 = sld [smem:[#allocation27_spill]]  ;;  %s1799_s24 = int_to_ptr.hbm [resolvable:$true] %s1798_s24 }
  0x3f   : > { %1115 = vmatpush.msrb.mxu0 %v1074_v12  ;;  %1144 = vmatpush.msrb.mxu1 %v1075_v13  ;;  %s2231_s7 = sshra.s32 %s1799_s24, 4  ;;  %s2237_s9 = scalar_lea.hbm %s2846_s20, 16  ;;  %s2232_s7 = int_to_ptr.hbm [resolvable:$true] %s2231_s7 }
  0x40   : > { %2057 = vmatmul.msk.f32.gmra.mxu0 %vm916_vm1, %v908_v10  ;;  %2066 = vmatmul.msk.f32.vlgmr.msrb.gmra.mxu2 %vm916_vm1, %v902_v11  ;;  %s2233_s21 = scalar_lea.hbm %s2232_s7, 8  ;;  %p2238_p1 = scmp.lt.s32.totalorder %s2232_s7, %s2846_s20 }
  0x41   : > { %2062 = vmatmul.msk.f32.gmra.mxu1 %vm916_vm1, %v908_v10  ;;  %2071 = vmatmul.msk.f32.vlgmr.msrb.gmra.mxu3 %vm916_vm1, %v902_v11  ;;  %p2234_p12 = scmp.ne.s32.totalorder %s2232_s7, %s2233_s21  ;;  %p2239_p2 = scmp.lt.s32.totalorder %s2237_s9, %s2233_s21 }
  0x42   : > { %2085 = vmatpush.msk.msra.mxu2 %vm1093_vm2, %v1174_v16  ;;  %2090 = vmatpush.msk.msra.mxu3 %vm1093_vm2, %v1175_v17 }
  0x43   : > { %1294 = vmatpush.msra.mxu0 %v1264_v24  ;;  %1323 = vmatpush.msra.mxu1 %v1265_v25  ;;  %p2235_p13 = pnand %p2234_p12, %p2480_p4  ;;  %p2240_p3 = por %p2239_p2, %p2238_p1 }
  0x44   : > { %1208 = vmatpush.msra.mxu2 %v1172_v18  ;;  %1237 = vmatpush.msra.mxu3 %v1173_v19  ;;  %s2849_s0 = smov %s2848_s3  ;;  %s1779_s22 = scalar_lea.hbm %s2848_s3, %s2135_s2 }
  0x45   : > { %1639 = vperm.xlu0 %2202, %v1636_v49   ;;  %1580 = vperm.xlu1 %2203, %v1577_v50   ;;  %p2236_p0 = pneg %p2235_p13 }
  0x46   : > { %1209 = vmatpush.msra.mxu2 %v1170_v20  ;;  %1238 = vmatpush.msra.mxu3 %v1171_v21 }
  0x47   : > { %p2241_p5 = pnand %p2240_p3, %p2236_p0 }
  0x48   : > { %2058 = vmatmul.msk.f32.gmra.mxu0 %vm916_vm1, %v909_v22  ;;  %2067 = vmatmul.msk.f32.gmra.mxu2 %vm916_vm1, %v903_v23 }
  0x49   : > { %2063 = vmatmul.msk.f32.gmra.mxu1 %vm916_vm1, %v909_v22  ;;  %2072 = vmatmul.msk.f32.gmra.mxu3 %vm916_vm1, %v903_v23 }
  0x4a   : > { %1378 = vmatpush.msrb.mxu2 %v1349_v30  ;;  %1407 = vmatpush.msrb.mxu3 %v1350_v31 }
  0x50   : > { %2068 = vmatmul.msk.f32.gmra.mxu2 %vm916_vm1, %v904_v26  ;;  %2076 = vmatmul.msk.f32.vlgmr.msrb.gmra.mxu0 %vm1080_vm3, %v1070_v27 }
  0x51   : > { %2073 = vmatmul.msk.f32.gmra.mxu3 %vm916_vm1, %v904_v26  ;;  %2081 = vmatmul.msk.f32.vlgmr.msrb.gmra.mxu1 %vm1080_vm3, %v1070_v27 }
  0x58   : > { %2069 = vmatmul.msk.f32.gmra.mxu2 %vm916_vm1, %v905_v28  ;;  %2077 = vmatmul.msk.f32.gmra.mxu0 %vm1080_vm3, %v1071_v29 }
  0x59   : > { %2074 = vmatmul.msk.f32.gmra.mxu3 %vm916_vm1, %v905_v28  ;;  %2082 = vmatmul.msk.f32.gmra.mxu1 %vm1080_vm3, %v1071_v29 }
  0x60   : > { %2078 = vmatmul.msk.f32.gmra.mxu0 %vm1080_vm3, %v1072_v32  ;;  %2086 = vmatmul.msk.f32.vlgmr.msra.gmra.mxu2 %vm1080_vm3, %v1166_v33 }
  0x61   : > { %2083 = vmatmul.msk.f32.gmra.mxu1 %vm1080_vm3, %v1072_v32  ;;  %2091 = vmatmul.msk.f32.vlgmr.msra.gmra.mxu3 %vm1080_vm3, %v1166_v33 }
  0x68   : > { %2079 = vmatmul.msk.f32.gmra.mxu0 %vm1080_vm3, %v1073_v34  ;;  %2087 = vmatmul.msk.f32.gmra.mxu2 %vm1080_vm3, %v1167_v35 }
  0x69   : > { %2084 = vmatmul.msk.f32.gmra.mxu1 %vm1080_vm3, %v1073_v34  ;;  %2092 = vmatmul.msk.f32.gmra.mxu3 %vm1080_vm3, %v1167_v35 }
  0x70   : > { %2088 = vmatmul.msk.f32.gmra.mxu2 %vm1080_vm3, %v1168_v39  ;;  %2095 = vmatmul.msk.f32.vlgmr.msra.gmra.mxu0 %vm1266_vm4, %v1260_v40 }
  0x71   : > { %2093 = vmatmul.msk.f32.gmra.mxu3 %vm1080_vm3, %v1168_v39  ;;  %2099 = vmatmul.msk.f32.vlgmr.msra.gmra.mxu1 %vm1266_vm4, %v1260_v40 }
  0x78   : > { %2089 = vmatmul.msk.f32.gmra.mxu2 %vm1080_vm3, %v1169_v43  ;;  %2096 = vmatmul.msk.f32.gmra.mxu0 %vm1266_vm4, %v1261_v44 }
  0x79   : > { %2094 = vmatmul.msk.f32.gmra.mxu3 %vm1080_vm3, %v1169_v43  ;;  %2100 = vmatmul.msk.f32.gmra.mxu1 %vm1266_vm4, %v1261_v44 }
  0x80   : > { %2097 = vmatmul.msk.f32.gmra.mxu0 %vm1266_vm4, %v1262_v47  ;;  %2103 = vmatmul.msk.f32.vlgmr.msrb.gmra.mxu2 %vm1266_vm4, %v1345_v48 }
  0x81   : > { %2101 = vmatmul.msk.f32.gmra.mxu1 %vm1266_vm4, %v1262_v47  ;;  %2107 = vmatmul.msk.f32.vlgmr.msrb.gmra.mxu3 %vm1266_vm4, %v1345_v48 }
  0x88   : > { %2098 = vmatmul.msk.f32.gmra.mxu0 %vm1266_vm4, %v1263_v51  ;;  %2104 = vmatmul.msk.f32.gmra.mxu2 %vm1266_vm4, %v1346_v52 }
  0x89   : > { %2102 = vmatmul.msk.f32.gmra.mxu1 %vm1266_vm4, %v1263_v51  ;;  %2108 = vmatmul.msk.f32.gmra.mxu3 %vm1266_vm4, %v1346_v52 }
  0x90   : > { %2105 = vmatmul.msk.f32.gmra.mxu2 %vm1266_vm4, %v1347_v53 }
  0x91   : > { %2109 = vmatmul.msk.f32.gmra.mxu3 %vm1266_vm4, %v1347_v53 }
  0x98   : > { %2106 = vmatmul.msk.f32.gmra.mxu2 %vm1266_vm4, %v1348_v54 }
  0x99   : > { %2110 = vmatmul.msk.f32.gmra.mxu3 %vm1266_vm4, %v1348_v54 }
  0x9e   : > { %v1451_v39 = vpop.permute.xlu0 %1450  ;;  %v1441_v46 = vpop.permute.xlu1 %1440 }
  0xb5   : > { %v951_v55 = vpop.f32.mrf.mxu0 }
  0xb6   : > { %v980_v56 = vpop.f32.mrf.mxu1 }
  0xbb   : > { %v960_v57 = vpop.f32.mrf.mxu2 }
  0xbc   : > { %v989_v58 = vpop.f32.mrf.mxu3 }
  0xbd   : > { %v954_v59 = vpop.f32.mrf.mxu0 }
  0xbe   : > { %v983_v60 = vpop.f32.mrf.mxu1 }
  0xc3   : > { %v1029_v61 = vpop.f32.mrf.mxu2 }
  0xc4   : > { %v1030_v62 = vadd.f32 %v1029_v61, %v951_v55  ;;  %v1058_v63 = vpop.f32.mrf.mxu3 }
  0xc5   : > { %v1059_v0 = vadd.f32 %v1058_v63, %v980_v56  ;;  %v957_v1 = vpop.f32.mrf.mxu0 }
  0xc6   : > { %v986_v2 = vpop.f32.mrf.mxu1 }
  0xcb   : > { %v1032_v3 = vpop.f32.mrf.mxu2 }
  0xcc   : > { %v1033_v4 = vadd.f32 %v1032_v3, %v954_v59  ;;  %v1061_v5 = vpop.f32.mrf.mxu3 }
  0xcd   : > { %v1062_v6 = vadd.f32 %v1061_v5, %v983_v60  ;;  %v1117_v7 = vpop.f32.mrf.mxu0 }
  0xce   : > { %v1146_v8 = vpop.f32.mrf.mxu1  ;;  %v1158_v54 = vadd.f32 %v1117_v7, %v1030_v62 }
  0xcf   : > { %v1159_v61 = vadd.f32 %v1146_v8, %v1059_v0 }
  0xd3   : > { %v1035_v9 = vpop.f32.mrf.mxu2 }
  0xd4   : > { %v1064_v10 = vpop.f32.mrf.mxu3  ;;  %v1036_v37 = vadd.f32 %v1035_v9, %v957_v1 }
  0xd5   : > { %v1120_v11 = vpop.f32.mrf.mxu0  ;;  %v1065_v38 = vadd.f32 %v1064_v10, %v986_v2 }
  0xd6   : > { %v1149_v13 = vpop.f32.mrf.mxu1  ;;  %v1160_v47 = vadd.f32 %v1120_v11, %v1033_v4 }
  0xd7   : > { %v1161_v50 = vadd.f32 %v1149_v13, %v1062_v6 }
  0xdb   : > { %v1038_v12 = vpop.f32.mrf.mxu2 }
  0xdc   : > { %v1067_v14 = vpop.f32.mrf.mxu3  ;;  %v1039_v41 = vadd.f32 %v1038_v12, %v960_v57 }
  0xdd   : > { %v1123_v17 = vpop.f32.mrf.mxu0  ;;  %v1068_v44 = vadd.f32 %v1067_v14, %v989_v58 }
  0xde   : > { %v1152_v18 = vpop.f32.mrf.mxu1  ;;  %v1162_v42 = vadd.f32 %v1123_v17, %v1036_v37  ;;  %v1446_v17 = vpop.permute.xlu0 %1445  ;;  %v1475_v37 = vld [vmem:[%s2793_s14 + $0x10] sm:$0xff] }
  0xdf   : > { %v1163_v45 = vadd.f32 %v1152_v18, %v1065_v38  ;;  %v1470_v38 = vld [vmem:[%s2792_s13 + $0x8] sm:$0xff] }
  0xe3   : > { %v1211_v15 = vpop.f32.mrf.mxu2 }
  0xe4   : > { %v1240_v16 = vpop.f32.mrf.mxu3  ;;  %v1252_v2 = vadd.f32 %v1211_v15, %v1158_v54 }
  0xe5   : > { %v1126_v21 = vpop.f32.mrf.mxu0  ;;  %v1253_v4 = vadd.f32 %v1240_v16, %v1159_v61 }
  0xe6   : > { %v1155_v22 = vpop.f32.mrf.mxu1  ;;  %v1164_v48 = vadd.f32 %v1126_v21, %v1039_v41  ;;  %v1436_v21 = vpop.permute.xlu1 %1435 }
  0xe7   : > { %v1165_v51 = vadd.f32 %v1155_v22, %v1068_v44 }
  0xeb   : > { %v1214_v19 = vpop.f32.mrf.mxu2 }
  0xec   : > { %v1243_v20 = vpop.f32.mrf.mxu3  ;;  %v1254_v55 = vadd.f32 %v1214_v19, %v1160_v47  ;;  %v1485_v47 = vpop.permute.xlu0 %1484 }
  0xed   : > { %v1296_v25 = vpop.f32.mrf.mxu0  ;;  %v1255_v63 = vadd.f32 %v1243_v20, %v1161_v50 }
  0xee   : > { %v1325_v26 = vpop.f32.mrf.mxu1  ;;  %v1337_v12 = vadd.f32 %v1296_v25, %v1252_v2 }
  0xef   : > { %v1338_v14 = vadd.f32 %v1325_v26, %v1253_v4  ;;  %v1476_v26 = vld [vmem:[%s2793_s14 + $0x18] sm:$0xff] }
  0xf0   : > { %1494 = vperm.xlu2 %2204, %v1476_v26  }
  0xf3   : > { %v1217_v23 = vpop.f32.mrf.mxu2 }
  0xf4   : > { %v1246_v24 = vpop.f32.mrf.mxu3  ;;  %v1256_v49 = vadd.f32 %v1217_v23, %v1162_v42 }
  0xf5   : > { %v1299_v29 = vpop.f32.mrf.mxu0  ;;  %v1257_v52 = vadd.f32 %v1246_v24, %v1163_v45 }
  0xf6   : > { %v1328_v31 = vpop.f32.mrf.mxu1  ;;  %v1339_v58 = vadd.f32 %v1299_v29, %v1254_v55 }
  0xf7   : > { %v1340_v9 = vadd.f32 %v1328_v31, %v1255_v63 }
  0xf8   : > { %1489 = vperm.xlu2 %2204, %v1475_v37  }
  0xfb   : > { %v1220_v27 = vpop.f32.mrf.mxu2 }
  0xfc   : > { %v1249_v28 = vpop.f32.mrf.mxu3  ;;  %v1258_v56 = vadd.f32 %v1220_v27, %v1164_v48 }
  0xfd   : > { %v1302_v35 = vpop.f32.mrf.mxu0  ;;  %v1259_v57 = vadd.f32 %v1249_v28, %v1165_v51 }
  0xfe   : > { %v1331_v36 = vpop.f32.mrf.mxu1  ;;  %v1341_v59 = vadd.f32 %v1302_v35, %v1256_v49  ;;  %v1469_v35 = vld [vmem:[%s2792_s13] sm:$0xff] }
  0xff   : > { %v1342_v1 = vadd.f32 %v1331_v36, %v1257_v52 }
 0x103   : > { %v1380_v30 = vpop.f32.mrf.mxu2 }
 0x104   : > { %v1409_v32 = vpop.f32.mrf.mxu3  ;;  %v1421_v8 = vadd.f32 %v1380_v30, %v1337_v12 }
 0x105   : > { %v1305_v53 = vpop.f32.mrf.mxu0  ;;  %v1422_v15 = vadd.f32 %v1409_v32, %v1338_v14 }
 0x106   : > { %v1334_v60 = vpop.f32.mrf.mxu1  ;;  %v1343_v3 = vadd.f32 %v1305_v53, %v1258_v56  ;;  %v1453_v29 = vadd.f32 %v1436_v21, %v1421_v8 }
 0x107   : > { %v1344_v10 = vadd.f32 %v1334_v60, %v1259_v57  ;;  %v1454_v31 = vadd.f32 %v1436_v21, %v1422_v15  ;;  %v1576_v21 = vld [vmem:[%s2794_s15] sm:$0x7] }
 0x109   : > { %v1462_v36 = vmax.f32 %v1454_v31, 0.0 }
 0x10b   : > { %v1383_v33 = vpop.f32.mrf.mxu2 }
 0x10c   : > { %v1412_v34 = vpop.f32.mrf.mxu3  ;;  %v1423_v13 = vadd.f32 %v1383_v33, %v1339_v58 }
 0x10d   : > { %v1424_v18 = vadd.f32 %v1412_v34, %v1340_v9  ;;  %v1461_v34 = vmax.f32 %v1453_v29, 0.0 }
 0x10e   : > { %v1455_v16 = vadd.f32 %v1441_v46, %v1423_v13 }
 0x10f   : > { %v1456_v27 = vadd.f32 %v1441_v46, %v1424_v18 }
 0x110   : > { %v1463_v30 = vmax.f32 %v1455_v16, 0.0 }
 0x111   : > { %v1464_v32 = vmax.f32 %v1456_v27, 0.0 }
 0x113   : > { %v1386_v40 = vpop.f32.mrf.mxu2 }
 0x114   : > { %v1415_v43 = vpop.f32.mrf.mxu3  ;;  %v1425_v5 = vadd.f32 %v1386_v40, %v1341_v59  ;;  %v1472_v40 = vld [vmem:[%s2792_s13 + $0x18] sm:$0xff] }
 0x115   : > { %v1426_v6 = vadd.f32 %v1415_v43, %v1342_v1  ;;  %v1480_v43 = vpop.permute.xlu1 %1479 }
 0x116   : > { %v1457_v19 = vadd.f32 %v1446_v17, %v1425_v5 }
 0x117   : > { %v1458_v22 = vadd.f32 %v1446_v17, %v1426_v6 }
 0x118   : > { %v1465_v25 = vmax.f32 %v1457_v19, 0.0 }
 0x119   : > { %v1466_v33 = vmax.f32 %v1458_v22, 0.0  ;;  %v1635_v22 = vld [vmem:[%s2796_s17] sm:$0xff] }
 0x11b   : > { %v1389_v11 = vpop.f32.mrf.mxu2 }
 0x11c   : > { %v1427_v62 = vadd.f32 %v1389_v11, %v1343_v3  ;;  %v1418_v7 = vpop.f32.mrf.mxu3 }
 0x11d   : > { %v1428_v0 = vadd.f32 %v1418_v7, %v1344_v10  ;;  %v1581_v31 = vpop.permute.xlu1 %1580 }
 0x11e   : > { %v1459_v20 = vadd.f32 %v1451_v39, %v1427_v62 }
 0x11f   : > { %v1460_v23 = vadd.f32 %v1451_v39, %v1428_v0  ;;  %v1471_v39 = vld [vmem:[%s2792_s13 + $0x10] sm:$0xff] }
 0x120   : > { %v1467_v24 = vmax.f32 %v1459_v20, 0.0 }
 0x121   : > { %v1468_v28 = vmax.f32 %v1460_v23, 0.0 }
 0x122   : > { %1522 = vmatpush.msrb.mxu0 %v1467_v24 }
 0x123   : > { %1551 = vmatpush.msrb.mxu1 %v1468_v28 }
 0x124   : > { %1523 = vmatpush.msrb.mxu0 %v1465_v25 }
 0x125   : > { %1552 = vmatpush.msrb.mxu1 %v1466_v33 }
 0x126   : > { %1524 = vmatpush.msrb.mxu0 %v1463_v30 }
 0x127   : > { %1553 = vmatpush.msrb.mxu1 %v1464_v32 }
 0x128   : > { %1525 = vmatpush.msrb.mxu0 %v1461_v34  ;;  %v1640_v34 = vpop.permute.xlu0 %1639 }
 0x129   : > { %1554 = vmatpush.msrb.mxu1 %v1462_v36  ;;  %2111 = vmatmul.msk.f32.vlgmr.msrb.gmra.mxu0 %vm1497_vm5, %v1469_v35 }
 0x12a   : > { %2115 = vmatmul.msk.f32.vlgmr.msrb.gmra.mxu1 %vm1497_vm5, %v1469_v35 }
 0x131   : > { %2112 = vmatmul.msk.f32.gmra.mxu0 %vm1497_vm5, %v1470_v38 }
 0x132   : > { %2116 = vmatmul.msk.f32.gmra.mxu1 %vm1497_vm5, %v1470_v38 }
 0x139   : > { %2113 = vmatmul.msk.f32.gmra.mxu0 %vm1497_vm5, %v1471_v39 }
 0x13a   : > { %2117 = vmatmul.msk.f32.gmra.mxu1 %vm1497_vm5, %v1471_v39 }
 0x141   : > { %2114 = vmatmul.msk.f32.gmra.mxu0 %vm1497_vm5, %v1472_v40 }
 0x142   : > { %2118 = vmatmul.msk.f32.gmra.mxu1 %vm1497_vm5, %v1472_v40 }
 0x14a   : > { %v1495_v44 = vpop.permute.xlu2 %1494 }
 0x152   : > { %v1490_v59 = vpop.permute.xlu2 %1489 }
 0x1a6   : > { %v1527_v41 = vpop.f32.mrf.mxu0 }
 0x1a7   : > { %v1556_v42 = vpop.f32.mrf.mxu1  ;;  %v1528_v45 = vadd.f32 %v1527_v41, %v1480_v43 }
 0x1a8   : > { %v1557_v46 = vadd.f32 %v1556_v42, %v1480_v43 }
 0x1a9   : > { %v1568_v49 = vmax.f32 %v1528_v45, 0.0 }
 0x1aa   : > { %v1569_v50 = vmax.f32 %v1557_v46, 0.0 }
 0x1ab   : > { %v1721_v54 = vmul.f32 %v1568_v49, %v1568_v49 }
 0x1ac   : > { %v1722_v55 = vmul.f32 %v1569_v50, %v1569_v50 }
 0x1ae   : > { %v1530_v48 = vpop.f32.mrf.mxu0  ;;  %v1729_v63 = vadd.f32 %v1722_v55, %v1721_v54 }
 0x1af   : > { %v1531_v51 = vadd.f32 %v1530_v48, %v1485_v47  ;;  %v1559_v52 = vpop.f32.mrf.mxu1 }
 0x1b0   : > { %v1560_v56 = vadd.f32 %v1559_v52, %v1485_v47 }
 0x1b1   : > { %v1570_v53 = vmax.f32 %v1531_v51, 0.0 }
 0x1b2   : > { %v1571_v57 = vmax.f32 %v1560_v56, 0.0 }
 0x1b3   : > { %v1723_v60 = vmul.f32 %v1570_v53, %v1570_v53 }
 0x1b4   : > { %v1724_v4 = vmul.f32 %v1571_v57, %v1571_v57 }
 0x1b5   : > { %v1730_v58 = vadd.f32 %v1729_v63, %v1723_v60 }
 0x1b6   : > { %v1533_v61 = vpop.f32.mrf.mxu0 }
 0x1b7   : > { %v1534_v1 = vadd.f32 %v1533_v61, %v1490_v59  ;;  %v1562_v2 = vpop.f32.mrf.mxu1  ;;  %v1731_v10 = vadd.f32 %v1730_v58, %v1724_v4 }
 0x1b8   : > { %v1563_v5 = vadd.f32 %v1562_v2, %v1490_v59 }
 0x1b9   : > { %v1572_v3 = vmax.f32 %v1534_v1, 0.0 }
 0x1ba   : > { %v1573_v6 = vmax.f32 %v1563_v5, 0.0 }
 0x1bb   : > { %v1725_v9 = vmul.f32 %v1572_v3, %v1572_v3 }
 0x1bc   : > { %v1726_v14 = vmul.f32 %v1573_v6, %v1573_v6 }
 0x1bd   : > { %v1732_v62 = vadd.f32 %v1731_v10, %v1725_v9 }
 0x1be   : > { %v1536_v11 = vpop.f32.mrf.mxu0 }
 0x1bf   : > { %v1537_v12 = vadd.f32 %v1536_v11, %v1495_v44  ;;  %v1565_v13 = vpop.f32.mrf.mxu1  ;;  %v1733_v8 = vadd.f32 %v1732_v62, %v1726_v14 }
 0x1c0   : > { %v1566_v7 = vadd.f32 %v1565_v13, %v1495_v44 }
 0x1c1   : > { %v1574_v17 = vmax.f32 %v1537_v12, 0.0 }
 0x1c2   : > { %v1575_v18 = vmax.f32 %v1566_v7, 0.0 }
 0x1c3   : > { %1598 = vmatpush.msra.mxu2 %v1574_v17  ;;  %v1727_v0 = vmul.f32 %v1574_v17, %v1574_v17 }
 0x1c4   : > { %1618 = vmatpush.msra.mxu3 %v1575_v18  ;;  %v1728_v19 = vmul.f32 %v1575_v18, %v1575_v18 }
 0x1c5   : > { %1599 = vmatpush.msra.mxu2 %v1572_v3  ;;  %v1734_v20 = vadd.f32 %v1733_v8, %v1727_v0 }
 0x1c6   : > { %1619 = vmatpush.msra.mxu3 %v1573_v6 }
 0x1c7   : > { %1600 = vmatpush.msra.mxu2 %v1570_v53  ;;  %v1735_v15 = vadd.f32 %v1734_v20, %v1728_v19 }
 0x1c8   : > { %1620 = vmatpush.msra.mxu3 %v1571_v57 }
 0x1c9   : > { %1736 = vadd.xlane.f32.xlu2 %v1735_v15  ;;  %1601 = vmatpush.msra.mxu2 %v1568_v49 }
 0x1ca   : > { %1621 = vmatpush.msra.mxu3 %v1569_v50  ;;  %2119 = vmatmul.msk.f32.vlgmr.msra.gmra.mxu2 %vm1497_vm5, %v1576_v21 }
 0x1cb   : > { %2120 = vmatmul.msk.f32.vlgmr.msra.gmra.mxu3 %vm1497_vm5, %v1576_v21  ;;  %1657 = vmatpush.msrb.mxu2 %v1574_v17 }
 0x1cc   : > { %1677 = vmatpush.msrb.mxu3 %v1575_v18 }
 0x1cd   : > { %1658 = vmatpush.msrb.mxu2 %v1572_v3 }
 0x1ce   : > { %1678 = vmatpush.msrb.mxu3 %v1573_v6 }
 0x1cf   : > { %1659 = vmatpush.msrb.mxu2 %v1570_v53 }
 0x1d0   : > { %1679 = vmatpush.msrb.mxu3 %v1571_v57 }
 0x1d1   : > { %1660 = vmatpush.msrb.mxu2 %v1568_v49 }
 0x1d2   : > { %1680 = vmatpush.msrb.mxu3 %v1569_v50  ;;  %2121 = vmatmul.msk.f32.vlgmr.msrb.gmra.mxu2 %vm1497_vm5, %v1635_v22 }
 0x1d3   : > { %2122 = vmatmul.msk.f32.vlgmr.msrb.gmra.mxu3 %vm1497_vm5, %v1635_v22 }
 0x23c   : > { %v1737_v23 = vpop.xlane.xlu2 %1736 }
 0x23d   : > { %v1738_v16 = vrot.slane %v1737_v23, 4 }
 0x23f   : > { %v1739_v24 = vadd.f32 %v1738_v16, %v1737_v23 }
 0x241   : > { %v1740_v27 = vrot.slane %v1739_v24, 2 }
 0x243   : > { %v1741_v28 = vadd.f32 %v1740_v27, %v1739_v24 }
 0x245   : > { %v1742_v29 = vrot.slane %v1741_v28, 1 }
 0x247   : > { %v1743_v25 = vadd.f32 %v1742_v29, %v1741_v28 }
 0x249   : > { %2139 = vpush %v1743_v25 }
 0x24d   : > { %v1603_v26 = vpop.f32.mrf.mxu2 }
 0x24e   : > { %v1623_v33 = vpop.f32.mrf.mxu3  ;;  %v1604_v30 = vadd.f32 %v1603_v26, %v1581_v31 }
 0x24f   : > { %v1624_v32 = vadd.f32 %v1623_v33, %v1581_v31 }
 0x251   : > { %2205 = vtanh.f32 %v1624_v32 }
 0x252   : > { %2207 = vtanh.f32 %v1604_v30 }
 0x255   : > { %v1662_v35 = vpop.f32.mrf.mxu2 }
 0x256   : > { %v1663_v36 = vadd.f32 %v1662_v35, %v1640_v34  ;;  %v1682_v37 = vpop.f32.mrf.mxu3 }
 0x257   : > { %v2206_v38 = vpop.eup %2205  ;;  %v1683_v39 = vadd.f32 %v1682_v37, %v1640_v34 }
 0x258   : > { %v1630_v40 = vrot.slane %v2206_v38, 4  ;;  %v1685_v41 = vrot.slane %v1663_v36, 4  ;;  %v2208_v42 = vpop.eup %2207 }
 0x259   : > { %v1691_v43 = vrot.slane %v1683_v39, 4 }
 0x25a   : > { %v1632_v44 = vsel %vm1631_vm6, %v2208_v42, %v1630_v40  ;;  %v1686_v45 = vmax.f32 %v1663_v36, %v1685_v41 }
 0x25b   : > { %1634 = vst [vmem:[%s899_s30] sm:$0x77] %v1632_v44  ;;  %v1692_v46 = vmax.f32 %v1683_v39, %v1691_v43 }
 0x25c   : > { %v1687_v47 = vrot.slane %v1686_v45, 2 }
 0x25d   : > { %v1693_v48 = vrot.slane %v1692_v46, 2 }
 0x25e   : > { %v1688_v49 = vmax.f32 %v1686_v45, %v1687_v47 }
 0x25f   : > { %v1694_v50 = vmax.f32 %v1692_v46, %v1693_v48 }
 0x260   : > { %v1689_v51 = vrot.slane %v1688_v49, 1 }
 0x261   : > { %v1695_v52 = vrot.slane %v1694_v50, 1 }
 0x262   : > { %v1690_v53 = vmax.f32 %v1688_v49, %v1689_v51 }
 0x263   : > { %v1696_v54 = vmax.f32 %v1694_v50, %v1695_v52 }
 0x264   : > { %v1697_v55 = vsub.f32 %v1663_v36, %v1690_v53 }
 0x265   : > { %v1698_v56 = vsub.f32 %v1683_v39, %v1696_v54 }
 0x266   : > { %v1699_v59 = vmul.f32 1.442695, %v1697_v55 }
 0x267   : > { %v1701_v60 = vmul.f32 1.442695, %v1698_v56 }
 0x268   : > { %2209 = vpow2.f32 %v1699_v59 }
 0x269   : > { %2211 = vpow2.f32 %v1701_v60 }
 0x26e   : > { %v2210_v61 = vpop.eup %2209 }
 0x26f   : > { %v2212_v63 = vpop.eup %2211  ;;  %v1703_v57 = vrot.slane %v2210_v61, 4 }
 0x270   : > { %v1709_v1 = vrot.slane %v2212_v63, 4 }
 0x271   : > { %v1704_v2 = vadd.f32 %v2210_v61, %v1703_v57 }
 0x272   : > { %v1710_v58 = vadd.f32 %v2212_v63, %v1709_v1 }
 0x273   : > { %v1705_v3 = vrot.slane %v1704_v2, 2 }
 0x274   : > { %v1711_v5 = vrot.slane %v1710_v58, 2 }
 0x275   : > { %v1706_v4 = vadd.f32 %v1705_v3, %v1704_v2 }
 0x276   : > { %v1712_v9 = vadd.f32 %v1711_v5, %v1710_v58 }
 0x277   : > { %v1707_v10 = vrot.slane %v1706_v4, 1 }
 0x278   : > { %v1713_v6 = vrot.slane %v1712_v9, 1 }
 0x279   : > { %v1708_v11 = vadd.f32 %v1707_v10, %v1706_v4 }
 0x27a   : > { %s2140_s1 = spop %2139  ;;  %v1714_v12 = vadd.f32 %v1713_v6, %v1712_v9 }
 0x27b   : > { %v1745_v13 = vstv %s2140_s1  ;;  %2213 = vrcp.f32 %v1708_v11 }
 0x27c   : > { %1746 = vst [vmem:[%s830_s26] sm:$0xff] %v1745_v13  ;;  %2215 = vrcp.f32 %v1714_v12 }
 0x27d   : > { %2244 = shalt.err (!%p2241_p5)
}
 0x27e   : > { %2142 = dma.vmem_to_hbm [thread:$0]  (%p2480_p4), %s1797_s28, 128, %s1799_s24, %s1762_s6  }
 0x27f   : > { %s823_s26 = scalar_lea.vmem [#allocation2], %s2041_s5  ;;  %s1783_s30 = sshll.u32 %s1779_s22, 4  ;;  %s1784_s30 = int_to_ptr.hbm [resolvable:$true] %s1783_s30 }
 0x280   : > { %s1781_s2 = sshll.u32 %s823_s26, 4  ;;  %s1757_s7 = scalar_lea.sflag [#allocation3], %s2723_s29  ;;  %s1782_s2 = int_to_ptr.vmem [resolvable:$true] %s1781_s2 }
 0x281   : > { %v2214_v62 = vpop.eup %2213  ;;  %s2259_s8 = sshra.s32 %s1784_s30, 4  ;;  %s2265_s28 = scalar_lea.hbm %s2849_s0, 32  ;;  %s2260_s8 = int_to_ptr.hbm [resolvable:$true] %s2259_s8 }
 0x282   : > { %v2216_v7 = vpop.eup %2215  ;;  %v1717_v14 = vmul.f32 %v2214_v62, %v2210_v61  ;;  %s2261_s9 = scalar_lea.hbm %s2260_s8, 16  ;;  %p2266_p10 = scmp.lt.s32.totalorder %s2260_s8, %s2849_s0 }
 0x283   : > { %v1718_v17 = vmul.f32 %v2216_v7, %v2212_v63  ;;  %p2262_p6 = scmp.ne.s32.totalorder %s2260_s8, %s2261_s9  ;;  %p2267_p11 = scmp.lt.s32.totalorder %s2265_s28, %s2261_s9 }
 0x284   : > { %1719 = vst [vmem:[%s823_s26] sm:$0xff] %v1717_v14 }
 0x285   : > { %1720 = vst [vmem:[%s823_s26 + $0x8] sm:$0xff] %v1718_v17  ;;  %p2263_p7 = pnand %p2262_p6, %p2480_p4  ;;  %p2268_p12 = por %p2267_p11, %p2266_p10 }
 0x287   : > { %p2264_p9 = pneg %p2263_p7 }
 0x289   : > { %p2269_p13 = pnand %p2268_p12, %p2264_p9 }
 0x28b   : > { %2272 = shalt.err (!%p2269_p13)
}
 0x28c   : > { %2141 = dma.vmem_to_hbm [thread:$0]  (%p2480_p4), %s1782_s2, 256, %s1784_s30, %s1757_s7  }
 0x28d PF: > { %s2850_s29 = sld [smem:[#allocation11_spill]] }
 0x28e   : > { %s2851_s4 = sld [smem:[#allocation8_spill]] }
 0x293   : > { %p2152_p0 = scmp.ge.s32.totalorder %s2850_s29, 2 }
 0x294   : > { %s1822_s22 = sand.u32 1, %s2851_s4  }
 0x295   : > { %p2146_p1 = pnand %p2152_p0, %p2487_p8  ;;  %s1823_s21 = scalar_lea.sflag [#allocation3], %s1822_s22 }
 0x297   : > { %p2147_p2 = pneg %p2146_p1 }
 0x299   : > { %2298 = dma.done.wait (%p2147_p2), %s1823_s21, 256  }
 0x29a   : > { %2300 = vsyncadd (%p2147_p2), %s1823_s21, 4294967040  ;;  %s1833_s27 = scalar_lea.sflag [#allocation5], %s1822_s22 }
 0x29b   : > { %2302 = dma.done.wait (%p2147_p2), %s1833_s27, 128  }
 0x29c   : > { %2304 = vsyncadd (%p2147_p2), %s1833_s27, 4294967168  ;;  %s38_s28 = sadd.s32 1, %s2850_s29   ;;  %s2853_s23 = sld [smem:[#allocation9_spill]] }
 0x29d   : > { %p35_p3 = scmp.ge.s32.totalorder %s38_s28, 4   ;;  %s2854_s26 = sld [smem:[#allocation15_spill]] }
 0x29e   : > { %s2855_s27 = sld [smem:[#allocation10_spill]]  ;;  %s2857_s2 = smov %s2311_s25 }
 0x29f   : > { %s2856_s3 = sld [smem:[#allocation12_spill]]  ;;  %37 = sbr.rel (!%p35_p3) target bundleno = 20 (0x14), region = 175 }
 0x2a2   : > { %s2858_s25 = smov %s2853_s23 }
 0x2a4   :  { %1839 = vsyncpa [#allocation3], 1 }
 0x2a5   :  { %1841 = vsyncpa [#allocation3 + $0x1], 1 }
 0x2a6   :  { %1842 = vsyncpa [#allocation5], 1 }
 0x2a7   :  { %1844 = vsyncpa [#allocation5 + $0x1], 1 }

</bundles_post_ra>
